<compile_context>
chip_gen: v5e
topology: v5e:2x2
jax: 0.10.0
libtpu: 0.0.40
codegen_flags: <defaults>
</compile_context>

<pallas_src>
import numpy as np

import jax
import jax.numpy as jnp
from jax.experimental import pallas as pl
from jax.experimental.pallas import tpu as pltpu


def mlp_kernel(x_ref, w1_ref, b1_ref, w2_ref, b2_ref, o_ref):
    # x_ref : (10, TILE_B)  batch on lanes (f32 or bf16)
    # w1_ref: (5, 10)       PyTorch (out, in) layout, same dtype as x
    # b1_ref: (5, 1)  f32
    # w2_ref: (5, 1)  f32   second-layer weight as a column vector
    # b2_ref: (1, 1)  f32   scalar bias in SMEM
    # o_ref : (1, TILE_B) f32
    h = jnp.dot(w1_ref[...], x_ref[...],
                preferred_element_type=jnp.float32)          # (5, TB) on MXU
    h = jnp.maximum(h + b1_ref[...], 0.0)                    # bias + ReLU (VPU)
    # 5 -> 1 contraction: lane-wise multiply + sublane reduction (XLU slot).
    y = jnp.sum(w2_ref[...] * h, axis=0, keepdims=True)      # (1, TB)
    o_ref[...] = (y + b2_ref[0, 0]).astype(o_ref.dtype)
    # TODO(synk): if a bundle dump shows the 1-of-8-sublane masked output vst
    # or the XLU reduce binding once DMA is saturated, emit the output as an
    # (8, TILE_B//8) slab or move the 5->1 contraction onto the MXU.


def _round_up(n, m):
    return ((n + m - 1) // m) * m


def _tpu_vmem_bytes():
    try:
        return int(pltpu.get_tpu_info().vmem_capacity_bytes)
    except Exception:
        return 64 << 20  # conservative: v7x has the smallest per-core VMEM


def my_model_forward(x, w1, b1, w2, b2, *, stream_dtype=jnp.float32,
                     feature_major=False, tile_b=None):
    """Forward pass of MyModel: linear2(relu(linear1(x))).

    x : (B, 10) float32   (or (10, B) if feature_major=True)
    w1: (5, 10), b1: (5,)   -- PyTorch nn.Linear(10, 5) layout
    w2: (1, 5),  b2: (1,)   -- PyTorch nn.Linear(5, 1) layout
    stream_dtype: dtype X / W1 are streamed in (bf16 halves the dominant HBM
                  read; MXU accumulation and all post-matmul math stay f32).
    returns (B, 1) float32
    """
    B = x.shape[1] if feature_major else x.shape[0]

    x_itemsize = np.dtype(stream_dtype).itemsize
    vmem_phys = _tpu_vmem_bytes()

    # VMEM bytes per batch lane per pipeline stage:
    #   X tile: 10 rows sublane-padded to 16, double-buffered
    #   out tile: 1 f32 row sublane-padded to 8, double-buffered
    per_lane = 2 * 16 * x_itemsize + 2 * 8 * 4

    if tile_b is None:
        # Biggest lane-dense tile that fits comfortably in this generation's
        # VMEM, but keep >= ~4 grid steps (2 per TensorCore on v7x megacore).
        budget = min(int(vmem_phys * 0.45), 48 << 20)
        cap = max(128, (budget // per_lane) // 128 * 128)
        tile_b = min(cap, _round_up(pl.cdiv(_round_up(B, 128), 4), 128))
    else:
        tile_b = _round_up(int(tile_b), 128)
    b_pad = _round_up(B, tile_b)

    # ---- layout plumbing (wrapper only): batch -> lane axis.
    # TODO(synk): if the producer can emit feature-major (10, B) X directly,
    # pass feature_major=True to drop this HBM transpose pass entirely.
    if feature_major:
        xt = x
        if b_pad != B:
            xt = jnp.pad(xt, ((0, 0), (0, b_pad - B)))
        xt = xt.astype(stream_dtype)
    else:
        if b_pad != B:
            x = jnp.pad(x, ((0, b_pad - B), (0, 0)))
        # pad + cast fuse into the (single) transpose pass over X.
        xt = x.astype(stream_dtype).T                         # (10, b_pad)

    w1_s = w1.astype(stream_dtype)                            # (5, 10)
    b1_col = b1.reshape(5, 1).astype(jnp.float32)
    w2_col = w2.reshape(1, 5).T.astype(jnp.float32)           # (5, 1)
    b2_sc = b2.reshape(1, 1).astype(jnp.float32)

    grid = (b_pad // tile_b,)
    flops = b_pad * (2 * 10 * 5 + 2 * 5 + 5)
    bytes_accessed = b_pad * (10 * x_itemsize + 4) + 70 * 4

    # Explicit scoped-VMEM limit: big enough for the double-buffered tiles
    # (+50% margin + weights/internal scratch), never above ~80% of physical.
    vmem_limit = max(32 << 20,
                     min(int(per_lane * tile_b * 1.5) + (2 << 20),
                         int(vmem_phys * 0.8)))

    out = pl.pallas_call(
        mlp_kernel,
        out_shape=jax.ShapeDtypeStruct((1, b_pad), jnp.float32),
        grid_spec=pltpu.PrefetchScalarGridSpec(
            num_scalar_prefetch=0,
            grid=grid,
            in_specs=[
                pl.BlockSpec((10, tile_b), lambda i: (0, i)),        # X (streamed)
                pl.BlockSpec((5, 10), lambda i: (0, 0)),             # W1 (resident)
                pl.BlockSpec((5, 1), lambda i: (0, 0)),              # b1 (resident)
                pl.BlockSpec((5, 1), lambda i: (0, 0)),              # W2 col (resident)
                pl.BlockSpec(memory_space=pltpu.MemorySpace.SMEM),   # b2 scalar
            ],
            out_specs=pl.BlockSpec((1, tile_b), lambda i: (0, i)),
        ),
        compiler_params=pltpu.CompilerParams(
            dimension_semantics=("parallel",),    # v7x: batch split over 2 TCs
            vmem_limit_bytes=vmem_limit,
        ),
        cost_estimate=pl.CostEstimate(
            flops=flops, transcendentals=0, bytes_accessed=bytes_accessed),
    )(xt, w1_s, b1_col, w2_col, b2_sc)

    return out[0, :B].reshape(B, 1)


def init_params(key):
    """Deterministic init matching nn.Linear shapes (PyTorch (out,in) layout)."""
    k1, k2, k3, k4 = jax.random.split(key, 4)
    bound1 = 1.0 / jnp.sqrt(10.0)
    bound2 = 1.0 / jnp.sqrt(5.0)
    w1 = jax.random.uniform(k1, (5, 10), jnp.float32, -bound1, bound1)
    b1 = jax.random.uniform(k2, (5,), jnp.float32, -bound1, bound1)
    w2 = jax.random.uniform(k3, (1, 5), jnp.float32, -bound2, bound2)
    b2 = jax.random.uniform(k4, (1,), jnp.float32, -bound2, bound2)
    return w1, b1, w2, b2


def _reference(x, w1, b1, w2, b2):
    return jnp.maximum(x @ w1.T + b1, 0.0) @ w2.T + b2


if __name__ == "__main__":
    key = jax.random.PRNGKey(0)
    k_params, k_x1, k_x2, k_x3 = jax.random.split(key, 4)
    w1, b1, w2, b2 = init_params(k_params)

    # 1) Small deterministic check (exact f32 path).
    B = 8
    x = jax.random.normal(k_x1, (B, 10), jnp.float32)
    out = jax.block_until_ready(my_model_forward(x, w1, b1, w2, b2))
    ref = _reference(x, w1, b1, w2, b2)
    assert out.shape == (B, 1)
    assert jnp.allclose(out, ref, atol=1e-5, rtol=1e-5)

    # 2) Batch not a multiple of the tile: exercises padding + multi-step grid.
    B2 = 300
    x2 = jax.random.normal(k_x2, (B2, 10), jnp.float32)
    out2 = jax.block_until_ready(my_model_forward(x2, w1, b1, w2, b2, tile_b=128))
    ref2 = _reference(x2, w1, b1, w2, b2)
    assert out2.shape == (B2, 1)
    assert jnp.allclose(out2, ref2, atol=1e-5, rtol=1e-5)

    # 3) bf16 streaming path (halved HBM read for X/W1, f32 accumulation).
    #    Compared against an f32 reference on bf16-rounded inputs, so only the
    #    accumulation order differs.
    B3 = 4096
    x3 = jax.random.normal(k_x3, (B3, 10), jnp.float32)
    out3 = jax.block_until_ready(
        my_model_forward(x3, w1, b1, w2, b2, stream_dtype=jnp.bfloat16))
    ref3 = _reference(x3.astype(jnp.bfloat16).astype(jnp.float32),
                      w1.astype(jnp.bfloat16).astype(jnp.float32), b1, w2, b2)
    assert out3.shape == (B3, 1)
    assert jnp.allclose(out3, ref3, atol=1e-3, rtol=1e-3)

    print("KERNEL_OK")
</pallas_src>

<mosaic_0001>
module attributes {stable_mosaic.version = 11 : i64} {
  func.func @mlp_kernel(%arg0: i32, %arg1: memref<10x128xf32, #tpu.memory_space<vmem>>, %arg2: memref<5x10xf32, #tpu.memory_space<vmem>>, %arg3: memref<5x1xf32, #tpu.memory_space<vmem>>, %arg4: memref<5x1xf32, #tpu.memory_space<vmem>>, %arg5: memref<1x1xf32, #tpu.memory_space<smem>>, %arg6: memref<1x128xf32, #tpu.memory_space<vmem>>) attributes {dimension_semantics = [#tpu.dimension_semantics<parallel>], iteration_bounds = array<i64: 1>, scalar_prefetch = 0 : i64, scratch_operands = 0 : i64, tpu.core_type = #tpu.core_type<tc>, window_params = [{transform_indices = @transform_0, window_bounds = array<i64: 10, 128>}, {pipeline_mode = #tpu.pipeline_mode<synchronous>, transform_indices = @transform_1, window_bounds = array<i64: 5, 10>}, {pipeline_mode = #tpu.pipeline_mode<synchronous>, transform_indices = @transform_2, window_bounds = array<i64: 5, 1>}, {pipeline_mode = #tpu.pipeline_mode<synchronous>, transform_indices = @transform_3, window_bounds = array<i64: 5, 1>}, {transform_indices = @transform_4, window_bounds = array<i64: 1, 1>}, {transform_indices = @transform_5, window_bounds = array<i64: 1, 128>}]} {
    %c0 = arith.constant 0 : index
    %c0_0 = arith.constant 0 : index
    %0 = vector.load %arg2[%c0, %c0_0] : memref<5x10xf32, #tpu.memory_space<vmem>>, vector<5x10xf32>
    %c0_1 = arith.constant 0 : index
    %c0_2 = arith.constant 0 : index
    %1 = vector.load %arg1[%c0_1, %c0_2] : memref<10x128xf32, #tpu.memory_space<vmem>>, vector<10x128xf32>
    %cst = arith.constant dense<0.000000e+00> : vector<5x128xf32>
    %2 = tpu.matmul %0, %1, %cst {dimension_numbers = #tpu.dot_dimension_numbers<[1], [0], [0], [1], [0, 0, 1, 1], [], []>} : vector<5x10xf32>, vector<10x128xf32>, vector<5x128xf32> -> vector<5x128xf32>
    %c0_3 = arith.constant 0 : index
    %c0_4 = arith.constant 0 : index
    %3 = vector.load %arg3[%c0_3, %c0_4] : memref<5x1xf32, #tpu.memory_space<vmem>>, vector<5x1xf32>
    %4 = vector.broadcast %3 : vector<5x1xf32> to vector<5x128xf32>
    %5 = arith.addf %2, %4 : vector<5x128xf32>
    %cst_5 = arith.constant 0.000000e+00 : f32
    %6 = vector.broadcast %cst_5 : f32 to vector<5x128xf32>
    %7 = arith.maximumf %5, %6 : vector<5x128xf32>
    %c0_6 = arith.constant 0 : index
    %c0_7 = arith.constant 0 : index
    %8 = vector.load %arg4[%c0_6, %c0_7] : memref<5x1xf32, #tpu.memory_space<vmem>>, vector<5x1xf32>
    %9 = vector.broadcast %8 : vector<5x1xf32> to vector<5x128xf32>
    %10 = arith.mulf %9, %7 : vector<5x128xf32>
    %cst_8 = arith.constant dense<0.000000e+00> : vector<128xf32>
    %11 = vector.multi_reduction <add>, %10, %cst_8 [0] : vector<5x128xf32> to vector<128xf32>
    %12 = vector.shape_cast %11 : vector<128xf32> to vector<1x128xf32>
    %c0_9 = arith.constant 0 : index
    %c0_10 = arith.constant 0 : index
    %13 = memref.load %arg5[%c0_9, %c0_10] : memref<1x1xf32, #tpu.memory_space<smem>>
    %14 = vector.broadcast %13 : f32 to vector<1x128xf32>
    %15 = arith.addf %12, %14 : vector<1x128xf32>
    %c0_11 = arith.constant 0 : index
    %c0_12 = arith.constant 0 : index
    %16 = vector.load %arg6[%c0_11, %c0_12] : memref<1x128xf32, #tpu.memory_space<vmem>>, vector<1x128xf32>
    tpu.vector_store %arg6[%c0_11, %c0_12], %15 {strides = array<i32>} : memref<1x128xf32, #tpu.memory_space<vmem>>, vector<1x128xf32>,
    return
  }
  func.func @transform_0(%arg0: i32) -> (i32, i32) {
    %c0_i32 = arith.constant 0 : i32
    %c0_i32_0 = arith.constant 0 : i32
    return %c0_i32, %arg0 : i32, i32
  }
  func.func @transform_1(%arg0: i32) -> (i32, i32) {
    %c0_i32 = arith.constant 0 : i32
    %c0_i32_0 = arith.constant 0 : i32
    %c0_i32_1 = arith.constant 0 : i32
    return %c0_i32, %c0_i32_0 : i32, i32
  }
  func.func @transform_2(%arg0: i32) -> (i32, i32) {
    %c0_i32 = arith.constant 0 : i32
    %c0_i32_0 = arith.constant 0 : i32
    %c0_i32_1 = arith.constant 0 : i32
    return %c0_i32, %c0_i32_0 : i32, i32
  }
  func.func @transform_3(%arg0: i32) -> (i32, i32) {
    %c0_i32 = arith.constant 0 : i32
    %c0_i32_0 = arith.constant 0 : i32
    %c0_i32_1 = arith.constant 0 : i32
    return %c0_i32, %c0_i32_0 : i32, i32
  }
  func.func @transform_4(%arg0: i32) -> (i32, i32) {
    %c0_i32 = arith.constant 0 : i32
    %c0_i32_0 = arith.constant 0 : i32
    %c0_i32_1 = arith.constant 0 : i32
    return %c0_i32, %c0_i32_0 : i32, i32
  }
  func.func @transform_5(%arg0: i32) -> (i32, i32) {
    %c0_i32 = arith.constant 0 : i32
    %c0_i32_0 = arith.constant 0 : i32
    return %c0_i32, %arg0 : i32, i32
  }
}

</mosaic_0001>

<bundles_post_ra>
// kernel: tpu_custom_call.1
= control target key start
LH: loop header
LB: loop body
LE: loop exit
PB: predicated region body
PF: predicated region fallthrough
CT: control target
= control target key end

     0   :  { %11 = vsyncpa [#allocation4], 0  ;;  %s222_s0 = inlined_call_operand.vmem [shape: f32[10,128], index: 0, kind: input, shape index: {}]   ;;  %s223_s1 = inlined_call_operand.hbm [shape: f32[5,10], index: 1, kind: input, shape index: {}]   ;;  %s224_s2 = inlined_call_operand.vmem [shape: f32[5,1], index: 2, kind: input, shape index: {}]   ;;  %s225_s3 = inlined_call_operand.vmem [shape: f32[5,1], index: 3, kind: input, shape index: {}]   ;;  %s226_s4 = inlined_call_operand.<no memory space> [shape: f32[1,1], index: 4, kind: input, shape index: {}]   ;;  %s227_s5 = inlined_call_operand.hbm [shape: f32[1,128], index: 5, kind: output, shape index: {}]  }
   0x1   :  { %12 = vsyncpa [#allocation5], 0  ;;  %s20_s20 = sshll.u32 %s223_s1, 4  ;;  %s168_s21 = smov [#allocation3]   ;;  %s21_s20 = int_to_ptr.hbm [resolvable:$true] %s20_s20 }
   0x2   :  { %s22_s22 = sshll.u32 %s168_s21, 4  ;;  %s23_s22 = int_to_ptr.vmem [resolvable:$true] %s22_s22 }
   0x3   :  { %25 = dma.hbm_to_vmem [thread:$0]  %s21_s20, 128, %s23_s22, [#allocation4]  }
   0x4   :  { %164 = dma.done.wait [#allocation4], 128  }
   0x5   :  { %165 = vsyncadd [#allocation4], 4294967168  ;;  %v169_v0 = vmov 0   ;;  %vm49_vm0 = vcmask 1041408   ;;  %v38_v1 = vld [vmem:[%s222_s0 + $0x8] sm:$0x3]  ;;  %v90_v18 = vstv %s226_s4 }
   0x6   :  { %115 = vset.pattern.permute.xlu0 %v169_v0  ;;  %v39_v2 = vld [vmem:[%s224_s2] sm:$0x1f]  ;;  %110 = vmatpush.msk.msra.mxu0 %vm49_vm0, %v38_v1  ;;  %vm45_vm1 = vcmask 80896   ;;  %vm81_vm2 = vcmask 1044480   ;;  %s170_s30 = smov [#allocation6]   ;;  %s100_s8 = sshll.u32 %s227_s5, 4  ;;  %s101_s8 = int_to_ptr.hbm [resolvable:$true] %s100_s8 }
   0x7   :  { %v37_v3 = vld [vmem:[%s222_s0] sm:$0xff]  ;;  %42 = vperm.xlu0 %115, %v39_v2  }
   0x8   :  { %v36_v4 = vld [vmem:[#allocation3] sm:$0x1f]  ;;  %68 = vmatpush.msra.mxu0 %v37_v3 }
   0x9   :  { %111 = vmatmul.msk.f32.vlgmr.msra.gmra.mxu0 %vm45_vm1, %v36_v4  ;;  %v74_v5 = vld [vmem:[%s225_s3] sm:$0x1f]  ;;  %s98_s3 = sshll.u32 %s170_s30, 4  ;;  %s99_s3 = int_to_ptr.vmem [resolvable:$true] %s98_s3 }
   0xf   :  { %77 = vperm.xlu0 %115, %v74_v5  }
  0x79   :  { %v43_v6 = vpop.permute.xlu0 %42 }
  0x81   :  { %v78_v10 = vpop.permute.xlu0 %77 }
  0x86   :  { %v70_v7 = vpop.f32.mrf.mxu0 }
  0x87   :  { %v71_v8 = vadd.f32 %v70_v7, %v43_v6 }
  0x89   :  { %v73_v9 = vmax.f32 %v71_v8, 0.0 }
  0x8b   :  { %v80_v11 = vmul.f32 %v78_v10, %v73_v9 }
  0x8d   :  { %v82_v12 = vsel %vm81_vm2, %v80_v11, 0.0 }
  0x8e   :  { %v83_v13 = vrot.slane %v82_v12, 4 }
  0x90   :  { %v84_v14 = vadd.f32 %v83_v13, %v82_v12 }
  0x92   :  { %v85_v15 = vrot.slane %v84_v14, 2 }
  0x94   :  { %v86_v16 = vadd.f32 %v85_v15, %v84_v14 }
  0x96   :  { %v87_v17 = vrot.slane %v86_v16, 1 }
  0x98   :  { %v88_v19 = vadd.f32 %v87_v17, %v86_v16 }
  0x9a   :  { %v91_v20 = vadd.f32 %v90_v18, %v88_v19 }
  0x9c   :  { %92 = vst [vmem:[#allocation6] sm:$0x1] %v91_v20 }
  0x9d   :  { %103 = dma.vmem_to_hbm [thread:$0]  %s99_s3, 16, %s101_s8, [#allocation5]  }
  0x9e   :  { %166 = dma.done.wait [#allocation5], 16  }
  0x9f   :  { %167 = vsyncadd [#allocation5], 4294967280 }
  0xa0   :  { %108 = vsyncpa [#allocation4], 1 }
  0xa1   :  { %109 = vsyncpa [#allocation5], 1 }

</bundles_post_ra>
